<compile_context>
chip_gen: v5e
topology: v5e:2x2
jax: 0.10.0
libtpu: 0.0.40
codegen_flags: <defaults>
</compile_context>

<pallas_src>
import jax
import jax.numpy as jnp
from jax.experimental import pallas as pl
from jax.experimental.pallas import tpu as pltpu


# ----------------------------- kernels --------------------------------------


def _dh_kernel_2d(x_ref, w1_ref, b1_ref, w2_ref, b2_ref, w3_ref, b3_ref, o_ref):
    """One batch element, one lane-dense L tile (NCL layout).

    x_ref:  (C, TL)      w1_ref: (C//2, C)    b1_ref: (C//2, 1)  (f32)
    o_ref:  (out, TL)    w2_ref: (C//4, C//2) b2_ref: (C//4, 1)
                         w3_ref: (out, C//4)  b3_ref: (out, 1)
    """
    cdt = w1_ref.dtype                      # compute dtype (f32 or bf16)
    x = x_ref[...].astype(cdt)              # in-kernel cast: free VPU op, no HBM pass

    # fc1 + ReLU   (dropout p=0.0 -> identity)
    h1 = jnp.dot(w1_ref[...], x, preferred_element_type=jnp.float32) + b1_ref[...]
    h1 = jnp.maximum(h1, 0.0)
    # fc2 + ReLU
    h2 = jnp.dot(w2_ref[...], h1.astype(cdt),
                 preferred_element_type=jnp.float32) + b2_ref[...]
    h2 = jnp.maximum(h2, 0.0)
    # fc3 (no activation)
    y = jnp.dot(w3_ref[...], h2.astype(cdt),
                preferred_element_type=jnp.float32) + b3_ref[...]
    o_ref[...] = y.astype(o_ref.dtype)


def _make_batched_kernel(tb):
    """Small-L path: TB batch elements per grid step, statically unrolled."""

    def kernel(x_ref, w1_ref, b1_ref, w2_ref, b2_ref, w3_ref, b3_ref, o_ref):
        cdt = w1_ref.dtype
        w1, w2, w3 = w1_ref[...], w2_ref[...], w3_ref[...]
        b1, b2, b3 = b1_ref[...], b2_ref[...], b3_ref[...]
        for b in range(tb):                 # tb is small and static
            xb = x_ref[b].astype(cdt)       # (C, L)
            h1 = jnp.maximum(
                jnp.dot(w1, xb, preferred_element_type=jnp.float32) + b1, 0.0)
            h2 = jnp.maximum(
                jnp.dot(w2, h1.astype(cdt),
                        preferred_element_type=jnp.float32) + b2, 0.0)
            y = jnp.dot(w3, h2.astype(cdt),
                        preferred_element_type=jnp.float32) + b3
            o_ref[b] = y.astype(o_ref.dtype)

    return kernel


# --------------------------- tiling helpers ----------------------------------


def _vmem_capacity_bytes():
    try:
        return int(pltpu.get_tpu_info().vmem_capacity_bytes)
    except Exception:
        return 64 << 20     # assume the smallest generation (v7x per-TC) if unknown


def _round_down(x, m):
    return (x // m) * m


def _choose_tile_l(L, B, C, c1, c2, out_c, x_bytes, w_bytes):
    """Lane-dense L tile sized to this chip's VMEM (generation-aware)."""
    cap = _vmem_capacity_bytes()
    budget = cap // 2                                     # headroom for Mosaic scratch
    # Resident weights + biases (assume 2 buffers in case Buffered(1) is rejected).
    fixed = 2 * ((c1 * C + c2 * c1 + out_c * c2) * w_bytes + (c1 + c2 + out_c) * 4)
    # Per-L-lane cost: 2x x tile, 2x out tile, f32 h1/h2, compute-dtype copy of x.
    per_lane = 2 * C * x_bytes + 2 * out_c * 4 + (c1 + c2) * 4 + C * w_bytes
    tile = _round_down(max(budget - fixed, 0) // per_lane, 128)
    tile = max(128, min(tile, 4096))
    if B == 1:
        # Keep >= 2 grid steps so both v7x TensorCores get work.
        tile = min(tile, max(128, _round_down(pl.cdiv(L, 2), 128)))
    # A tile wider than L just wastes VMEM.
    tile = min(tile, max(128, _round_down(L, 128)))
    return tile


def _choose_batch_block(B, L):
    """Batch elements per grid step on the small-L (L < 128) path."""
    cap = max(1, min(8, 128 // max(L, 1)))
    if B >= 2:
        cap = max(1, min(cap, B // 2))      # keep >= 2 grid steps for v7x's 2 TCs
    tb = 1
    for d in range(1, cap + 1):             # largest divisor of B <= cap
        if B % d == 0:
            tb = d
    return tb


# ------------------------------ wrapper ---------------------------------------


def detection_head_pallas(x, params, *, compute_dtype=None):
    """x: (B, C, L) float32 (PyTorch NCL layout). Returns (B, out_channels, L).

    compute_dtype: MXU input dtype (weights + in-kernel x cast); accumulation,
    bias add and ReLU always stay f32.  jnp.bfloat16 is recommended on v5e.
    """
    w1, b1, w2, b2, w3, b3 = params
    B, C, L = x.shape
    c1, c2, out_c = w1.shape[0], w2.shape[0], w3.shape[0]

    cdt = jnp.dtype(compute_dtype) if compute_dtype is not None else x.dtype
    w1c, w2c, w3c = w1.astype(cdt), w2.astype(cdt), w3.astype(cdt)
    # Biases stay f32 (added to the f32 MXU accumulator), shaped (N, 1) so they
    # broadcast along the lane (L) axis inside the kernel.
    b1c = b1.reshape(c1, 1).astype(jnp.float32)
    b2c = b2.reshape(c2, 1).astype(jnp.float32)
    b3c = b3.reshape(out_c, 1).astype(jnp.float32)

    x_bytes = x.dtype.itemsize
    w_bytes = cdt.itemsize

    const = lambda *_: (0, 0)   # weights/biases: same block every step -> resident

    if L < 128:
        # Small-L path: pack TB batch elements per step to amortize grid overhead.
        tb = _choose_batch_block(B, L)
        grid = (pl.cdiv(B, tb),)
        kernel = _make_batched_kernel(tb)
        x_spec = pl.BlockSpec((tb, C, L), lambda b: (b, 0, 0))
        o_spec = pl.BlockSpec((tb, out_c, L), lambda b: (b, 0, 0))
        dims = ("parallel",)
    else:
        tile_l = _choose_tile_l(L, B, C, c1, c2, out_c, x_bytes, w_bytes)
        grid = (B, pl.cdiv(L, tile_l))
        kernel = _dh_kernel_2d
        x_spec = pl.BlockSpec((None, C, tile_l), lambda b, j: (b, 0, j))
        o_spec = pl.BlockSpec((None, out_c, tile_l), lambda b, j: (b, 0, j))
        dims = ("parallel", "parallel")

    vmem_limit = min((3 * _vmem_capacity_bytes()) // 4, 112 << 20)

    cost = pl.CostEstimate(
        flops=2 * B * L * (C * c1 + c1 * c2 + c2 * out_c),
        transcendentals=0,
        bytes_accessed=(B * C * L * x_bytes + B * out_c * L * x_bytes
                        + (c1 * C + c2 * c1 + out_c * c2) * w_bytes
                        + (c1 + c2 + out_c) * 4),
    )

    def build(single_buffer_weights):
        wmode = ({"pipeline_mode": pl.Buffered(1)}
                 if single_buffer_weights else {})
        in_specs = [
            x_spec,
            pl.BlockSpec((c1, C), const, **wmode),
            pl.BlockSpec((c1, 1), const, **wmode),
            pl.BlockSpec((c2, c1), const, **wmode),
            pl.BlockSpec((c2, 1), const, **wmode),
            pl.BlockSpec((out_c, c2), const, **wmode),
            pl.BlockSpec((out_c, 1), const, **wmode),
        ]
        return pl.pallas_call(
            kernel,
            out_shape=jax.ShapeDtypeStruct((B, out_c, L), x.dtype),
            grid=grid,
            in_specs=in_specs,
            out_specs=o_spec,
            compiler_params=pltpu.CompilerParams(
                dimension_semantics=dims,
                vmem_limit_bytes=vmem_limit),
            cost_estimate=cost,
        )

    args = (x, w1c, b1c, w2c, b2c, w3c, b3c)
    try:
        # Weights never change across the grid -> ask for a single buffer each.
        return build(True)(*args)
    except Exception:
        # Fallback if this jax version rejects Buffered(1): default pipelining.
        return build(False)(*args)


# ------------------------------ reference -------------------------------------


def detection_head_ref(x, params):
    """Pure-JAX reference mirroring the PyTorch forward (dropout p=0.0)."""
    w1, b1, w2, b2, w3, b3 = params
    # Conv1d(kernel_size=1): y[b, o, l] = sum_i w[o, i] * x[b, i, l] + b[o]
    h = jnp.einsum('oi,bil->bol', w1, x) + b1[None, :, None]
    h = jnp.maximum(h, 0.0)
    h = jnp.einsum('oi,bil->bol', w2, h) + b2[None, :, None]
    h = jnp.maximum(h, 0.0)
    return jnp.einsum('oi,bil->bol', w3, h) + b3[None, :, None]


def make_params(key, in_channels, out_channels, dtype=jnp.float32):
    c1, c2 = in_channels // 2, in_channels // 4
    ks = jax.random.split(key, 6)
    # Deterministic synthetic init (roughly kaiming-ish scale); not a checkpoint load.
    w1 = jax.random.normal(ks[0], (c1, in_channels), dtype) * (1.0 / in_channels) ** 0.5
    b1 = jax.random.normal(ks[1], (c1,), dtype) * 0.01
    w2 = jax.random.normal(ks[2], (c2, c1), dtype) * (1.0 / c1) ** 0.5
    b2 = jax.random.normal(ks[3], (c2,), dtype) * 0.01
    w3 = jax.random.normal(ks[4], (out_channels, c2), dtype) * (1.0 / c2) ** 0.5
    b3 = jax.random.normal(ks[5], (out_channels,), dtype) * 0.01
    return (w1, b1, w2, b2, w3, b3)


if __name__ == "__main__":
    # Small shapes consistent with the module: batch=2, in_channels=32, seq=8.
    B, C, L, OUT = 2, 32, 8, 2
    key = jax.random.PRNGKey(0)
    kx, kp = jax.random.split(key)
    x = jax.random.normal(kx, (B, C, L), jnp.float32)
    params = make_params(kp, C, OUT)

    # TODO(synk): dropout is p=0.0 (identity) per the module default; non-zero
    # dropout would use pltpu.prng_seed / pltpu.stateful_bernoulli in-kernel.

    ref = detection_head_ref(x, params)

    # f32 path, small-L batched kernel (strict check).
    out = jax.block_until_ready(detection_head_pallas(x, params))
    assert out.shape == (B, OUT, L), out.shape
    assert jnp.allclose(out, ref, atol=1e-4, rtol=1e-4), "f32 mismatch vs reference"

    # bf16 MXU path (weights bf16, in-kernel x cast, f32 accumulate).
    out_bf16 = jax.block_until_ready(
        detection_head_pallas(x, params, compute_dtype=jnp.bfloat16))
    assert out_bf16.shape == (B, OUT, L), out_bf16.shape
    assert jnp.allclose(out_bf16, ref, atol=0.12, rtol=0.12), "bf16 mismatch vs reference"

    # Large-L tiled path (lane-dense 128-multiple tiles), still small overall.
    L2 = 384
    x2 = jax.random.normal(kx, (B, C, L2), jnp.float32)
    ref2 = detection_head_ref(x2, params)
    out2 = jax.block_until_ready(detection_head_pallas(x2, params))
    assert out2.shape == (B, OUT, L2), out2.shape
    assert jnp.allclose(out2, ref2, atol=1e-4, rtol=1e-4), "tiled f32 mismatch vs reference"

    print("KERNEL_OK")
</pallas_src>

<mosaic_0001>
module attributes {stable_mosaic.version = 11 : i64} {
  func.func @kernel(%arg0: i32, %arg1: memref<1x32x8xf32, #tpu.memory_space<vmem>>, %arg2: memref<16x32xf32, #tpu.memory_space<vmem>>, %arg3: memref<16x1xf32, #tpu.memory_space<vmem>>, %arg4: memref<8x16xf32, #tpu.memory_space<vmem>>, %arg5: memref<8x1xf32, #tpu.memory_space<vmem>>, %arg6: memref<2x8xf32, #tpu.memory_space<vmem>>, %arg7: memref<2x1xf32, #tpu.memory_space<vmem>>, %arg8: memref<1x2x8xf32, #tpu.memory_space<vmem>>) attributes {dimension_semantics = [#tpu.dimension_semantics<parallel>], iteration_bounds = array<i64: 2>, scalar_prefetch = 0 : i64, scratch_operands = 0 : i64, tpu.core_type = #tpu.core_type<tc>, window_params = [{transform_indices = @transform_0, window_bounds = array<i64: 1, 32, 8>}, {pipeline_mode = #tpu.pipeline_mode<synchronous>, transform_indices = @transform_1, window_bounds = array<i64: 16, 32>}, {pipeline_mode = #tpu.pipeline_mode<synchronous>, transform_indices = @transform_2, window_bounds = array<i64: 16, 1>}, {pipeline_mode = #tpu.pipeline_mode<synchronous>, transform_indices = @transform_3, window_bounds = array<i64: 8, 16>}, {pipeline_mode = #tpu.pipeline_mode<synchronous>, transform_indices = @transform_4, window_bounds = array<i64: 8, 1>}, {pipeline_mode = #tpu.pipeline_mode<synchronous>, transform_indices = @transform_5, window_bounds = array<i64: 2, 8>}, {pipeline_mode = #tpu.pipeline_mode<synchronous>, transform_indices = @transform_6, window_bounds = array<i64: 2, 1>}, {transform_indices = @transform_7, window_bounds = array<i64: 1, 2, 8>}]} {
    %c0 = arith.constant 0 : index
    %c0_0 = arith.constant 0 : index
    %0 = vector.load %arg2[%c0, %c0_0] : memref<16x32xf32, #tpu.memory_space<vmem>>, vector<16x32xf32>
    %c0_1 = arith.constant 0 : index
    %c0_2 = arith.constant 0 : index
    %1 = vector.load %arg4[%c0_1, %c0_2] : memref<8x16xf32, #tpu.memory_space<vmem>>, vector<8x16xf32>
    %c0_3 = arith.constant 0 : index
    %c0_4 = arith.constant 0 : index
    %2 = vector.load %arg6[%c0_3, %c0_4] : memref<2x8xf32, #tpu.memory_space<vmem>>, vector<2x8xf32>
    %c0_5 = arith.constant 0 : index
    %c0_6 = arith.constant 0 : index
    %3 = vector.load %arg3[%c0_5, %c0_6] : memref<16x1xf32, #tpu.memory_space<vmem>>, vector<16x1xf32>
    %c0_7 = arith.constant 0 : index
    %c0_8 = arith.constant 0 : index
    %4 = vector.load %arg5[%c0_7, %c0_8] : memref<8x1xf32, #tpu.memory_space<vmem>>, vector<8x1xf32>
    %c0_9 = arith.constant 0 : index
    %c0_10 = arith.constant 0 : index
    %5 = vector.load %arg7[%c0_9, %c0_10] : memref<2x1xf32, #tpu.memory_space<vmem>>, vector<2x1xf32>
    %c0_11 = arith.constant 0 : index
    %c0_12 = arith.constant 0 : index
    %c0_13 = arith.constant 0 : index
    %6 = vector.load %arg1[%c0_11, %c0_12, %c0_13] : memref<1x32x8xf32, #tpu.memory_space<vmem>>, vector<1x32x8xf32>
    %7 = vector.shape_cast %6 : vector<1x32x8xf32> to vector<32x8xf32>
    %cst = arith.constant dense<0.000000e+00> : vector<16x8xf32>
    %8 = tpu.matmul %0, %7, %cst {dimension_numbers = #tpu.dot_dimension_numbers<[1], [0], [0], [1], [0, 0, 1, 1], [], []>} : vector<16x32xf32>, vector<32x8xf32>, vector<16x8xf32> -> vector<16x8xf32>
    %9 = vector.broadcast %3 : vector<16x1xf32> to vector<16x8xf32>
    %10 = arith.addf %8, %9 : vector<16x8xf32>
    %cst_14 = arith.constant 0.000000e+00 : f32
    %11 = vector.broadcast %cst_14 : f32 to vector<16x8xf32>
    %12 = arith.maximumf %10, %11 : vector<16x8xf32>
    %cst_15 = arith.constant dense<0.000000e+00> : vector<8x8xf32>
    %13 = tpu.matmul %1, %12, %cst_15 {dimension_numbers = #tpu.dot_dimension_numbers<[1], [0], [0], [1], [0, 0, 1, 1], [], []>} : vector<8x16xf32>, vector<16x8xf32>, vector<8x8xf32> -> vector<8x8xf32>
    %14 = vector.broadcast %4 : vector<8x1xf32> to vector<8x8xf32>
    %15 = arith.addf %13, %14 : vector<8x8xf32>
    %cst_16 = arith.constant 0.000000e+00 : f32
    %16 = vector.broadcast %cst_16 : f32 to vector<8x8xf32>
    %17 = arith.maximumf %15, %16 : vector<8x8xf32>
    %cst_17 = arith.constant dense<0.000000e+00> : vector<2x8xf32>
    %18 = tpu.matmul %2, %17, %cst_17 {dimension_numbers = #tpu.dot_dimension_numbers<[1], [0], [0], [1], [0, 0, 1, 1], [], []>} : vector<2x8xf32>, vector<8x8xf32>, vector<2x8xf32> -> vector<2x8xf32>
    %19 = vector.broadcast %5 : vector<2x1xf32> to vector<2x8xf32>
    %20 = arith.addf %18, %19 : vector<2x8xf32>
    %c0_18 = arith.constant 0 : index
    %c0_19 = arith.constant 0 : index
    %c0_20 = arith.constant 0 : index
    %21 = vector.load %arg8[%c0_18, %c0_19, %c0_20] : memref<1x2x8xf32, #tpu.memory_space<vmem>>, vector<1x2x8xf32>
    %22 = vector.shape_cast %21 : vector<1x2x8xf32> to vector<2x8xf32>
    %23 = vector.shape_cast %20 : vector<2x8xf32> to vector<1x2x8xf32>
    tpu.vector_store %arg8[%c0_18, %c0_19, %c0_20], %23 {strides = array<i32>} : memref<1x2x8xf32, #tpu.memory_space<vmem>>, vector<1x2x8xf32>,
    return
  }
  func.func @transform_0(%arg0: i32) -> (i32, i32, i32) {
    %c0_i32 = arith.constant 0 : i32
    %c0_i32_0 = arith.constant 0 : i32
    %c0_i32_1 = arith.constant 0 : i32
    return %arg0, %c0_i32, %c0_i32_0 : i32, i32, i32
  }
  func.func @transform_1(%arg0: i32) -> (i32, i32) {
    %c0_i32 = arith.constant 0 : i32
    %c0_i32_0 = arith.constant 0 : i32
    %c0_i32_1 = arith.constant 0 : i32
    return %c0_i32, %c0_i32_0 : i32, i32
  }
  func.func @transform_2(%arg0: i32) -> (i32, i32) {
    %c0_i32 = arith.constant 0 : i32
    %c0_i32_0 = arith.constant 0 : i32
    %c0_i32_1 = arith.constant 0 : i32
    return %c0_i32, %c0_i32_0 : i32, i32
  }
  func.func @transform_3(%arg0: i32) -> (i32, i32) {
    %c0_i32 = arith.constant 0 : i32
    %c0_i32_0 = arith.constant 0 : i32
    %c0_i32_1 = arith.constant 0 : i32
    return %c0_i32, %c0_i32_0 : i32, i32
  }
  func.func @transform_4(%arg0: i32) -> (i32, i32) {
    %c0_i32 = arith.constant 0 : i32
    %c0_i32_0 = arith.constant 0 : i32
    %c0_i32_1 = arith.constant 0 : i32
    return %c0_i32, %c0_i32_0 : i32, i32
  }
  func.func @transform_5(%arg0: i32) -> (i32, i32) {
    %c0_i32 = arith.constant 0 : i32
    %c0_i32_0 = arith.constant 0 : i32
    %c0_i32_1 = arith.constant 0 : i32
    return %c0_i32, %c0_i32_0 : i32, i32
  }
  func.func @transform_6(%arg0: i32) -> (i32, i32) {
    %c0_i32 = arith.constant 0 : i32
    %c0_i32_0 = arith.constant 0 : i32
    %c0_i32_1 = arith.constant 0 : i32
    return %c0_i32, %c0_i32_0 : i32, i32
  }
  func.func @transform_7(%arg0: i32) -> (i32, i32, i32) {
    %c0_i32 = arith.constant 0 : i32
    %c0_i32_0 = arith.constant 0 : i32
    %c0_i32_1 = arith.constant 0 : i32
    return %arg0, %c0_i32, %c0_i32_0 : i32, i32, i32
  }
}

module attributes {stable_mosaic.version = 11 : i64} {
  func.func @kernel(%arg0: i32, %arg1: memref<1x32x8xf32, #tpu.memory_space<vmem>>, %arg2: memref<16x32xf32, #tpu.memory_space<vmem>>, %arg3: memref<16x1xf32, #tpu.memory_space<vmem>>, %arg4: memref<8x16xf32, #tpu.memory_space<vmem>>, %arg5: memref<8x1xf32, #tpu.memory_space<vmem>>, %arg6: memref<2x8xf32, #tpu.memory_space<vmem>>, %arg7: memref<2x1xf32, #tpu.memory_space<vmem>>, %arg8: memref<1x2x8xf32, #tpu.memory_space<vmem>>) attributes {dimension_semantics = [#tpu.dimension_semantics<parallel>], iteration_bounds = array<i64: 2>, scalar_prefetch = 0 : i64, scratch_operands = 0 : i64, tpu.core_type = #tpu.core_type<tc>, window_params = [{transform_indices = @transform_0, window_bounds = array<i64: 1, 32, 8>}, {pipeline_mode = #tpu.pipeline_mode<synchronous>, transform_indices = @transform_1, window_bounds = array<i64: 16, 32>}, {pipeline_mode = #tpu.pipeline_mode<synchronous>, transform_indices = @transform_2, window_bounds = array<i64: 16, 1>}, {pipeline_mode = #tpu.pipeline_mode<synchronous>, transform_indices = @transform_3, window_bounds = array<i64: 8, 16>}, {pipeline_mode = #tpu.pipeline_mode<synchronous>, transform_indices = @transform_4, window_bounds = array<i64: 8, 1>}, {pipeline_mode = #tpu.pipeline_mode<synchronous>, transform_indices = @transform_5, window_bounds = array<i64: 2, 8>}, {pipeline_mode = #tpu.pipeline_mode<synchronous>, transform_indices = @transform_6, window_bounds = array<i64: 2, 1>}, {transform_indices = @transform_7, window_bounds = array<i64: 1, 2, 8>}]} {
    %c0 = arith.constant 0 : index
    %c0_0 = arith.constant 0 : index
    %0 = vector.load %arg2[%c0, %c0_0] : memref<16x32xf32, #tpu.memory_space<vmem>>, vector<16x32xf32>
    %c0_1 = arith.constant 0 : index
    %c0_2 = arith.constant 0 : index
    %1 = vector.load %arg4[%c0_1, %c0_2] : memref<8x16xf32, #tpu.memory_space<vmem>>, vector<8x16xf32>
    %c0_3 = arith.constant 0 : index
    %c0_4 = arith.constant 0 : index
    %2 = vector.load %arg6[%c0_3, %c0_4] : memref<2x8xf32, #tpu.memory_space<vmem>>, vector<2x8xf32>
    %c0_5 = arith.constant 0 : index
    %c0_6 = arith.constant 0 : index
    %3 = vector.load %arg3[%c0_5, %c0_6] : memref<16x1xf32, #tpu.memory_space<vmem>>, vector<16x1xf32>
    %c0_7 = arith.constant 0 : index
    %c0_8 = arith.constant 0 : index
    %4 = vector.load %arg5[%c0_7, %c0_8] : memref<8x1xf32, #tpu.memory_space<vmem>>, vector<8x1xf32>
    %c0_9 = arith.constant 0 : index
    %c0_10 = arith.constant 0 : index
    %5 = vector.load %arg7[%c0_9, %c0_10] : memref<2x1xf32, #tpu.memory_space<vmem>>, vector<2x1xf32>
    %c0_11 = arith.constant 0 : index
    %c0_12 = arith.constant 0 : index
    %c0_13 = arith.constant 0 : index
    %6 = vector.load %arg1[%c0_11, %c0_12, %c0_13] : memref<1x32x8xf32, #tpu.memory_space<vmem>>, vector<1x32x8xf32>
    %7 = vector.shape_cast %6 : vector<1x32x8xf32> to vector<32x8xf32>
    %cst = arith.constant dense<0.000000e+00> : vector<16x8xf32>
    %8 = tpu.matmul %0, %7, %cst {dimension_numbers = #tpu.dot_dimension_numbers<[1], [0], [0], [1], [0, 0, 1, 1], [], []>} : vector<16x32xf32>, vector<32x8xf32>, vector<16x8xf32> -> vector<16x8xf32>
    %9 = vector.broadcast %3 : vector<16x1xf32> to vector<16x8xf32>
    %10 = arith.addf %8, %9 : vector<16x8xf32>
    %cst_14 = arith.constant 0.000000e+00 : f32
    %11 = vector.broadcast %cst_14 : f32 to vector<16x8xf32>
    %12 = arith.maximumf %10, %11 : vector<16x8xf32>
    %cst_15 = arith.constant dense<0.000000e+00> : vector<8x8xf32>
    %13 = tpu.matmul %1, %12, %cst_15 {dimension_numbers = #tpu.dot_dimension_numbers<[1], [0], [0], [1], [0, 0, 1, 1], [], []>} : vector<8x16xf32>, vector<16x8xf32>, vector<8x8xf32> -> vector<8x8xf32>
    %14 = vector.broadcast %4 : vector<8x1xf32> to vector<8x8xf32>
    %15 = arith.addf %13, %14 : vector<8x8xf32>
    %cst_16 = arith.constant 0.000000e+00 : f32
    %16 = vector.broadcast %cst_16 : f32 to vector<8x8xf32>
    %17 = arith.maximumf %15, %16 : vector<8x8xf32>
    %cst_17 = arith.constant dense<0.000000e+00> : vector<2x8xf32>
    %18 = tpu.matmul %2, %17, %cst_17 {dimension_numbers = #tpu.dot_dimension_numbers<[1], [0], [0], [1], [0, 0, 1, 1], [], []>} : vector<2x8xf32>, vector<8x8xf32>, vector<2x8xf32> -> vector<2x8xf32>
    %19 = vector.broadcast %5 : vector<2x1xf32> to vector<2x8xf32>
    %20 = arith.addf %18, %19 : vector<2x8xf32>
    %c0_18 = arith.constant 0 : index
    %c0_19 = arith.constant 0 : index
    %c0_20 = arith.constant 0 : index
    %21 = vector.load %arg8[%c0_18, %c0_19, %c0_20] : memref<1x2x8xf32, #tpu.memory_space<vmem>>, vector<1x2x8xf32>
    %22 = vector.shape_cast %21 : vector<1x2x8xf32> to vector<2x8xf32>
    %23 = vector.shape_cast %20 : vector<2x8xf32> to vector<1x2x8xf32>
    tpu.vector_store %arg8[%c0_18, %c0_19, %c0_20], %23 {strides = array<i32>} : memref<1x2x8xf32, #tpu.memory_space<vmem>>, vector<1x2x8xf32>,
    return
  }
  func.func @transform_0(%arg0: i32) -> (i32, i32, i32) {
    %c0_i32 = arith.constant 0 : i32
    %c0_i32_0 = arith.constant 0 : i32
    %c0_i32_1 = arith.constant 0 : i32
    return %arg0, %c0_i32, %c0_i32_0 : i32, i32, i32
  }
  func.func @transform_1(%arg0: i32) -> (i32, i32) {
    %c0_i32 = arith.constant 0 : i32
    %c0_i32_0 = arith.constant 0 : i32
    %c0_i32_1 = arith.constant 0 : i32
    return %c0_i32, %c0_i32_0 : i32, i32
  }
  func.func @transform_2(%arg0: i32) -> (i32, i32) {
    %c0_i32 = arith.constant 0 : i32
    %c0_i32_0 = arith.constant 0 : i32
    %c0_i32_1 = arith.constant 0 : i32
    return %c0_i32, %c0_i32_0 : i32, i32
  }
  func.func @transform_3(%arg0: i32) -> (i32, i32) {
    %c0_i32 = arith.constant 0 : i32
    %c0_i32_0 = arith.constant 0 : i32
    %c0_i32_1 = arith.constant 0 : i32
    return %c0_i32, %c0_i32_0 : i32, i32
  }
  func.func @transform_4(%arg0: i32) -> (i32, i32) {
    %c0_i32 = arith.constant 0 : i32
    %c0_i32_0 = arith.constant 0 : i32
    %c0_i32_1 = arith.constant 0 : i32
    return %c0_i32, %c0_i32_0 : i32, i32
  }
  func.func @transform_5(%arg0: i32) -> (i32, i32) {
    %c0_i32 = arith.constant 0 : i32
    %c0_i32_0 = arith.constant 0 : i32
    %c0_i32_1 = arith.constant 0 : i32
    return %c0_i32, %c0_i32_0 : i32, i32
  }
  func.func @transform_6(%arg0: i32) -> (i32, i32) {
    %c0_i32 = arith.constant 0 : i32
    %c0_i32_0 = arith.constant 0 : i32
    %c0_i32_1 = arith.constant 0 : i32
    return %c0_i32, %c0_i32_0 : i32, i32
  }
  func.func @transform_7(%arg0: i32) -> (i32, i32, i32) {
    %c0_i32 = arith.constant 0 : i32
    %c0_i32_0 = arith.constant 0 : i32
    %c0_i32_1 = arith.constant 0 : i32
    return %arg0, %c0_i32, %c0_i32_0 : i32, i32, i32
  }
}

</mosaic_0001>

<bundles_post_ra>
// kernel: tpu_custom_call.1
= control target key start
LH: loop header
LB: loop body
LE: loop exit
PB: predicated region body
PF: predicated region fallthrough
CT: control target
= control target key end

     0   :  { %12 = vsyncpa [#allocation3], 0  ;;  %s743_s0 = inlined_call_operand.vmem [shape: f32[2,32,8], index: 0, kind: input, shape index: {}]   ;;  %s744_s1 = inlined_call_operand.vmem [shape: f32[16,32], index: 1, kind: input, shape index: {}]   ;;  %s745_s2 = inlined_call_operand.vmem [shape: f32[16,1], index: 2, kind: input, shape index: {}]   ;;  %s746_s3 = inlined_call_operand.vmem [shape: f32[8,16], index: 3, kind: input, shape index: {}]   ;;  %s747_s4 = inlined_call_operand.vmem [shape: f32[8,1], index: 4, kind: input, shape index: {}]   ;;  %s748_s5 = inlined_call_operand.vmem [shape: f32[2,8], index: 5, kind: input, shape index: {}]   ;;  %s749_s6 = inlined_call_operand.vmem [shape: f32[2,1], index: 6, kind: input, shape index: {}]   ;;  %s750_s7 = inlined_call_operand.hbm [shape: f32[2,2,8], index: 7, kind: output, shape index: {}]  }
   0x1   :  { %14 = vsyncpa [#allocation3 + $0x1], 0  ;;  %s634_s24 = smov 0   ;;  %s636_s25 = smov 0  }
   0x2   :  { %s638_s26 = smov 0   ;;  %s640_s27 = smov 0  }
   0x3 LB: > { %s655_s28 = sadd.s32 4294967295, %s591_s27   ;;  %s467_s29 = sadd.s32 4294967294, %s591_s27   ;;  %s591_s27 = sphi %s640_s27, %s756_s27   ;;  %s587_s26 = sphi %s638_s26, %s755_s26   ;;  %s583_s25 = sphi %s636_s25, %s754_s25   ;;  %s579_s24 = sphi %s634_s24, %s753_s24  }
   0x4   : > { %s659_s30 = sadd.s32 1, %s591_s27   ;;  %s179_s8 = sadd.s32 1, %s587_s26 }
   0x5   : > { %s176_s9 = ssub.s32 %s591_s27, %s659_s30  ;;  %p189_p0 = scmp.ne.s32.totalorder %s587_s26, %s583_s25 }
   0x6   : > { %p177_p1 = scmp.eq.s32.totalorder %s176_s9, 0  ;;  %p190_p2 = scmp.eq.s32.totalorder %s655_s28, 1 }
   0x7   : > { %p195_p3 = scmp.ne.s32.totalorder %s583_s25, %s579_s24  ;;  %p196_p4 = scmp.eq.s32.totalorder %s467_s29, 1 }
   0x8   : > { %s670_s10 = scalar_select %p177_p1, %s587_s26, %s179_s8  }
   0x9   : > { %p672_p5 = por %p190_p2, %p189_p0  ;;  %p676_p6 = por %p196_p4, %p195_p3 }
   0xa   : > { %p470_p7 = scmp.ge.s32.totalorder %s591_s27, 1  ;;  %p240_p8 = scmp.lt.s32.totalorder %s591_s27, 3 }
   0xc   : > { %p241_p9 = pnand %p470_p7, %p240_p8 }
   0xd   : > { %p272_p10 = scmp.lt.s32.totalorder (!%p241_p9), %s655_s28, 1  ;;  %s269_s20 = sand.u32 (!%p241_p9), 1, %s583_s25  }
   0xe   : > { %244 = sbr.rel (%p241_p9) target bundleno = 438 (0x1b6), region = 48  ;;  %s471_s21 = sshll.u32 (!%p241_p9), %s269_s20, 1 }
   0xf   : > { %s479_s22 = sshll.u32 (!%p241_p9), %s655_s28, 1  ;;  %s271_s9 = scalar_lea.vmem (!%p241_p9), [#allocation2], %s471_s21 }
  0x10   : > { %s403_s8 = scalar_lea.hbm (!%p241_p9), %s750_s7, %s479_s22  ;;  %s405_s13 = sshll.u32 (!%p241_p9), %s271_s9, 4  ;;  %s406_s13 = int_to_ptr.vmem [resolvable:$true] %s405_s13 }
  0x11   : > { %s407_s14 = sshll.u32 (!%p241_p9), %s403_s8, 4  ;;  %s408_s14 = int_to_ptr.hbm [resolvable:$true] %s407_s14 }
  0x13   : > { %v282_v0 = vld [vmem:[%s745_s2 + $0x8] sm:$0xff]  ;;  %v593_v1 = vmov 0   ;;  %s273_s15 = scalar_select %p272_p10, %s655_s28, 1  ;;  %v281_v4 = vld [vmem:[%s745_s2] sm:$0xff]  ;;  %vm299_vm0 = vcmask 261120   ;;  %vm336_vm1 = vcmask 130048  }
  0x14   : > { %527 = vset.pattern.permute.xlu0 %v593_v1  ;;  %528 = vset.pattern.permute.xlu1 %v593_v1  ;;  %v277_v7 = vld [vmem:[%s744_s1] sm:$0xff]  ;;  %v278_v8 = vld [vmem:[%s744_s1 + $0x8] sm:$0xff]  ;;  %vm366_vm2 = vcmask 64512   ;;  %vm390_vm3 = vcmask 58368  }
  0x15   : > { %296 = vperm.xlu0 %527, %v282_v0   ;;  %s482_s16 = sshll.u32 %s273_s15, 5  ;;  %v283_v9 = vld [vmem:[%s747_s4] sm:$0xff]  ;;  %s393_s15 = scalar_lea.sflag [#allocation3], %s269_s20 }
  0x16   : > { %s276_s19 = scalar_lea.vmem %s743_s0, %s482_s16  ;;  %333 = vperm.xlu1 %528, %v283_v9   ;;  %v284_v10 = vld [vmem:[%s749_s6] sm:$0x3]  ;;  %s543_s16 = sshra.s32 %s408_s14, 4  ;;  %s544_s16 = int_to_ptr.hbm [resolvable:$true] %s543_s16 }
  0x17   : > { %v288_v2 = vld [vmem:[%s276_s19 + $0x18] sm:$0xff]  ;;  %v287_v3 = vld [vmem:[%s276_s19 + $0x10] sm:$0xff]  ;;  %v286_v5 = vld [vmem:[%s276_s19 + $0x8] sm:$0xff]  ;;  %s545_s17 = scalar_lea.hbm %s544_s16, 2  ;;  %p550_p0 = scmp.lt.s32.totalorder %s544_s16, %s750_s7 }
  0x18   : > { %318 = vmatpush.msra.mxu0 %v288_v2  ;;  %483 = vmatpush.msra.mxu3 %v288_v2  ;;  %v285_v6 = vld [vmem:[%s276_s19] sm:$0xff]  ;;  %p546_p11 = scmp.ne.s32.totalorder %s544_s16, %s545_s17  ;;  %s549_s19 = scalar_lea.hbm %s750_s7, 4 }
  0x19   : > { %v279_v19 = vld [vmem:[%s746_s3] sm:$0xff]  ;;  %p551_p1 = scmp.lt.s32.totalorder %s549_s19, %s545_s17 }
  0x1a   : > { %319 = vmatpush.msra.mxu0 %v287_v3  ;;  %484 = vmatpush.msra.mxu3 %v287_v3  ;;  %v280_v24 = vld [vmem:[%s748_s5] sm:$0x3]  ;;  %p547_p12 = pnand %p546_p11, %p672_p5 }
  0x1b   : > { %p552_p2 = por %p551_p1, %p550_p0 }
  0x1c   : > { %320 = vmatpush.msra.mxu0 %v286_v5  ;;  %485 = vmatpush.msra.mxu3 %v286_v5  ;;  %p548_p13 = pneg %p547_p12 }
  0x1d   : > { %291 = vperm.xlu0 %527, %v281_v4  }
  0x1e   : > { %321 = vmatpush.msra.mxu0 %v285_v6  ;;  %486 = vmatpush.msra.mxu3 %v285_v6  ;;  %p553_p3 = pnand %p552_p2, %p548_p13 }
  0x1f   : > { %474 = vmatmul.msk.f32.vlgmr.msra.gmra.mxu0 %vm299_vm0, %v277_v7  ;;  %475 = vmatmul.msk.f32.vlgmr.msra.gmra.mxu3 %vm299_vm0, %v278_v8 }
  0x20   : > { %363 = vperm.xlu1 %528, %v284_v10  }
  0x87   : > { %v297_v11 = vpop.permute.xlu0 %296 }
  0x88   : > { %v334_v20 = vpop.permute.xlu1 %333 }
  0x8f   : > { %v292_v12 = vpop.permute.xlu0 %291 }
  0x92   : > { %v364_v25 = vpop.permute.xlu1 %363 }
  0x9c   : > { %v323_v13 = vpop.f32.mrf.mxu0 }
  0x9d   : > { %v324_v15 = vadd.f32 %v323_v13, %v292_v12 }
  0x9f   : > { %v329_v18 = vmax.f32 %v324_v15, 0.0 }
  0xa2   : > { %v326_v14 = vpop.f32.mrf.mxu3 }
  0xa3   : > { %v327_v16 = vadd.f32 %v326_v14, %v297_v11 }
  0xa5   : > { %v330_v17 = vmax.f32 %v327_v16, 0.0 }
  0xa7   : > { %354 = vmatpush.msra.mxu1 %v330_v17 }
  0xa9   : > { %355 = vmatpush.msra.mxu1 %v329_v18 }
  0xaa   : > { %476 = vmatmul.msk.f32.vlgmr.msra.gmra.mxu1 %vm336_vm1, %v279_v19 }
 0x127   : > { %v357_v21 = vpop.f32.mrf.mxu1 }
 0x128   : > { %v358_v22 = vadd.f32 %v357_v21, %v334_v20 }
 0x12a   : > { %v360_v23 = vmax.f32 %v358_v22, 0.0 }
 0x12c   : > { %385 = vmatpush.msra.mxu2 %v360_v23 }
 0x12d   : > { %477 = vmatmul.msk.f32.vlgmr.msra.gmra.mxu2 %vm366_vm2, %v280_v24 }
 0x1b0   : > { %v387_v26 = vpop.f32.mrf.mxu2 }
 0x1b1   : > { %v388_v27 = vadd.f32 %v387_v26, %v364_v25 }
 0x1b3   : > { %391 = vst.msk [vmem:[%s271_s9] sm:$0x3] %vm390_vm3, %v388_v27 }
 0x1b4   : > { %556 = shalt.err (!%p553_p3)
}
 0x1b5   : > { %487 = dma.vmem_to_hbm [thread:$0]  (%p672_p5), %s406_s13, 32, %s408_s14, %s393_s15  }
 0x1b6 PF: > { %p493_p4 = scmp.ge.s32.totalorder %s591_s27, 2  ;;  %s419_s20 = sand.u32 1, %s579_s24  }
 0x1b7   : > { %s420_s23 = scalar_lea.sflag [#allocation3], %s419_s20 }
 0x1b8   : > { %p490_p7 = pnand %p493_p4, %p676_p6 }
 0x1ba   : > { %p491_p8 = pneg %p490_p7 }
 0x1bc   : > { %574 = dma.done.wait (%p491_p8), %s420_s23, 32  }
 0x1bd   : > { %576 = vsyncadd (%p491_p8), %s420_s23, 4294967264  ;;  %p17_p9 = scmp.ge.s32.totalorder %s659_s30, 4   ;;  %s753_s24 = smov %s583_s25 }
 0x1be   : > { %s754_s25 = smov %s587_s26  ;;  %s755_s26 = smov %s670_s10 }
 0x1bf   : > { %s756_s27 = smov %s659_s30  ;;  %19 = sbr.rel (!%p17_p9) target bundleno = 3 (0x3), region = 83 }
 0x1c4   :  { %426 = vsyncpa [#allocation3], 1 }
 0x1c5   :  { %428 = vsyncpa [#allocation3 + $0x1], 1 }

// kernel: tpu_custom_call.1
= control target key start
LH: loop header
LB: loop body
LE: loop exit
PB: predicated region body
PF: predicated region fallthrough
CT: control target
= control target key end

     0   :  { %12 = vsyncpa [#allocation3], 0  ;;  %s743_s0 = inlined_call_operand.vmem [shape: f32[2,32,8], index: 0, kind: input, shape index: {}]   ;;  %s744_s1 = inlined_call_operand.vmem [shape: f32[16,32], index: 1, kind: input, shape index: {}]   ;;  %s745_s2 = inlined_call_operand.vmem [shape: f32[16,1], index: 2, kind: input, shape index: {}]   ;;  %s746_s3 = inlined_call_operand.vmem [shape: f32[8,16], index: 3, kind: input, shape index: {}]   ;;  %s747_s4 = inlined_call_operand.vmem [shape: f32[8,1], index: 4, kind: input, shape index: {}]   ;;  %s748_s5 = inlined_call_operand.vmem [shape: f32[2,8], index: 5, kind: input, shape index: {}]   ;;  %s749_s6 = inlined_call_operand.vmem [shape: f32[2,1], index: 6, kind: input, shape index: {}]   ;;  %s750_s7 = inlined_call_operand.hbm [shape: f32[2,2,8], index: 7, kind: output, shape index: {}]  }
   0x1   :  { %14 = vsyncpa [#allocation3 + $0x1], 0  ;;  %s634_s24 = smov 0   ;;  %s636_s25 = smov 0  }
   0x2   :  { %s638_s26 = smov 0   ;;  %s640_s27 = smov 0  }
   0x3 LB: > { %s655_s28 = sadd.s32 4294967295, %s591_s27   ;;  %s467_s29 = sadd.s32 4294967294, %s591_s27   ;;  %s591_s27 = sphi %s640_s27, %s756_s27   ;;  %s587_s26 = sphi %s638_s26, %s755_s26   ;;  %s583_s25 = sphi %s636_s25, %s754_s25   ;;  %s579_s24 = sphi %s634_s24, %s753_s24  }
   0x4   : > { %s659_s30 = sadd.s32 1, %s591_s27   ;;  %s179_s8 = sadd.s32 1, %s587_s26 }
   0x5   : > { %s176_s9 = ssub.s32 %s591_s27, %s659_s30  ;;  %p189_p0 = scmp.ne.s32.totalorder %s587_s26, %s583_s25 }
   0x6   : > { %p177_p1 = scmp.eq.s32.totalorder %s176_s9, 0  ;;  %p190_p2 = scmp.eq.s32.totalorder %s655_s28, 1 }
   0x7   : > { %p195_p3 = scmp.ne.s32.totalorder %s583_s25, %s579_s24  ;;  %p196_p4 = scmp.eq.s32.totalorder %s467_s29, 1 }
   0x8   : > { %s670_s10 = scalar_select %p177_p1, %s587_s26, %s179_s8  }
   0x9   : > { %p672_p5 = por %p190_p2, %p189_p0  ;;  %p676_p6 = por %p196_p4, %p195_p3 }
   0xa   : > { %p470_p7 = scmp.ge.s32.totalorder %s591_s27, 1  ;;  %p240_p8 = scmp.lt.s32.totalorder %s591_s27, 3 }
   0xc   : > { %p241_p9 = pnand %p470_p7, %p240_p8 }
   0xd   : > { %p272_p10 = scmp.lt.s32.totalorder (!%p241_p9), %s655_s28, 1  ;;  %s269_s20 = sand.u32 (!%p241_p9), 1, %s583_s25  }
   0xe   : > { %244 = sbr.rel (%p241_p9) target bundleno = 438 (0x1b6), region = 48  ;;  %s471_s21 = sshll.u32 (!%p241_p9), %s269_s20, 1 }
   0xf   : > { %s479_s22 = sshll.u32 (!%p241_p9), %s655_s28, 1  ;;  %s271_s9 = scalar_lea.vmem (!%p241_p9), [#allocation2], %s471_s21 }
  0x10   : > { %s403_s8 = scalar_lea.hbm (!%p241_p9), %s750_s7, %s479_s22  ;;  %s405_s13 = sshll.u32 (!%p241_p9), %s271_s9, 4  ;;  %s406_s13 = int_to_ptr.vmem [resolvable:$true] %s405_s13 }
  0x11   : > { %s407_s14 = sshll.u32 (!%p241_p9), %s403_s8, 4  ;;  %s408_s14 = int_to_ptr.hbm [resolvable:$true] %s407_s14 }
  0x13   : > { %v282_v0 = vld [vmem:[%s745_s2 + $0x8] sm:$0xff]  ;;  %v593_v1 = vmov 0   ;;  %s273_s15 = scalar_select %p272_p10, %s655_s28, 1  ;;  %v281_v4 = vld [vmem:[%s745_s2] sm:$0xff]  ;;  %vm299_vm0 = vcmask 261120   ;;  %vm336_vm1 = vcmask 130048  }
  0x14   : > { %527 = vset.pattern.permute.xlu0 %v593_v1  ;;  %528 = vset.pattern.permute.xlu1 %v593_v1  ;;  %v277_v7 = vld [vmem:[%s744_s1] sm:$0xff]  ;;  %v278_v8 = vld [vmem:[%s744_s1 + $0x8] sm:$0xff]  ;;  %vm366_vm2 = vcmask 64512   ;;  %vm390_vm3 = vcmask 58368  }
  0x15   : > { %296 = vperm.xlu0 %527, %v282_v0   ;;  %s482_s16 = sshll.u32 %s273_s15, 5  ;;  %v283_v9 = vld [vmem:[%s747_s4] sm:$0xff]  ;;  %s393_s15 = scalar_lea.sflag [#allocation3], %s269_s20 }
  0x16   : > { %s276_s19 = scalar_lea.vmem %s743_s0, %s482_s16  ;;  %333 = vperm.xlu1 %528, %v283_v9   ;;  %v284_v10 = vld [vmem:[%s749_s6] sm:$0x3]  ;;  %s543_s16 = sshra.s32 %s408_s14, 4  ;;  %s544_s16 = int_to_ptr.hbm [resolvable:$true] %s543_s16 }
  0x17   : > { %v288_v2 = vld [vmem:[%s276_s19 + $0x18] sm:$0xff]  ;;  %v287_v3 = vld [vmem:[%s276_s19 + $0x10] sm:$0xff]  ;;  %v286_v5 = vld [vmem:[%s276_s19 + $0x8] sm:$0xff]  ;;  %s545_s17 = scalar_lea.hbm %s544_s16, 2  ;;  %p550_p0 = scmp.lt.s32.totalorder %s544_s16, %s750_s7 }
  0x18   : > { %318 = vmatpush.msra.mxu0 %v288_v2  ;;  %483 = vmatpush.msra.mxu3 %v288_v2  ;;  %v285_v6 = vld [vmem:[%s276_s19] sm:$0xff]  ;;  %p546_p11 = scmp.ne.s32.totalorder %s544_s16, %s545_s17  ;;  %s549_s19 = scalar_lea.hbm %s750_s7, 4 }
  0x19   : > { %v279_v19 = vld [vmem:[%s746_s3] sm:$0xff]  ;;  %p551_p1 = scmp.lt.s32.totalorder %s549_s19, %s545_s17 }
  0x1a   : > { %319 = vmatpush.msra.mxu0 %v287_v3  ;;  %484 = vmatpush.msra.mxu3 %v287_v3  ;;  %v280_v24 = vld [vmem:[%s748_s5] sm:$0x3]  ;;  %p547_p12 = pnand %p546_p11, %p672_p5 }
  0x1b   : > { %p552_p2 = por %p551_p1, %p550_p0 }
  0x1c   : > { %320 = vmatpush.msra.mxu0 %v286_v5  ;;  %485 = vmatpush.msra.mxu3 %v286_v5  ;;  %p548_p13 = pneg %p547_p12 }
  0x1d   : > { %291 = vperm.xlu0 %527, %v281_v4  }
  0x1e   : > { %321 = vmatpush.msra.mxu0 %v285_v6  ;;  %486 = vmatpush.msra.mxu3 %v285_v6  ;;  %p553_p3 = pnand %p552_p2, %p548_p13 }
  0x1f   : > { %474 = vmatmul.msk.f32.vlgmr.msra.gmra.mxu0 %vm299_vm0, %v277_v7  ;;  %475 = vmatmul.msk.f32.vlgmr.msra.gmra.mxu3 %vm299_vm0, %v278_v8 }
  0x20   : > { %363 = vperm.xlu1 %528, %v284_v10  }
  0x87   : > { %v297_v11 = vpop.permute.xlu0 %296 }
  0x88   : > { %v334_v20 = vpop.permute.xlu1 %333 }
  0x8f   : > { %v292_v12 = vpop.permute.xlu0 %291 }
  0x92   : > { %v364_v25 = vpop.permute.xlu1 %363 }
  0x9c   : > { %v323_v13 = vpop.f32.mrf.mxu0 }
  0x9d   : > { %v324_v15 = vadd.f32 %v323_v13, %v292_v12 }
  0x9f   : > { %v329_v18 = vmax.f32 %v324_v15, 0.0 }
  0xa2   : > { %v326_v14 = vpop.f32.mrf.mxu3 }
  0xa3   : > { %v327_v16 = vadd.f32 %v326_v14, %v297_v11 }
  0xa5   : > { %v330_v17 = vmax.f32 %v327_v16, 0.0 }
  0xa7   : > { %354 = vmatpush.msra.mxu1 %v330_v17 }
  0xa9   : > { %355 = vmatpush.msra.mxu1 %v329_v18 }
  0xaa   : > { %476 = vmatmul.msk.f32.vlgmr.msra.gmra.mxu1 %vm336_vm1, %v279_v19 }
 0x127   : > { %v357_v21 = vpop.f32.mrf.mxu1 }
 0x128   : > { %v358_v22 = vadd.f32 %v357_v21, %v334_v20 }
 0x12a   : > { %v360_v23 = vmax.f32 %v358_v22, 0.0 }
 0x12c   : > { %385 = vmatpush.msra.mxu2 %v360_v23 }
 0x12d   : > { %477 = vmatmul.msk.f32.vlgmr.msra.gmra.mxu2 %vm366_vm2, %v280_v24 }
 0x1b0   : > { %v387_v26 = vpop.f32.mrf.mxu2 }
 0x1b1   : > { %v388_v27 = vadd.f32 %v387_v26, %v364_v25 }
 0x1b3   : > { %391 = vst.msk [vmem:[%s271_s9] sm:$0x3] %vm390_vm3, %v388_v27 }
 0x1b4   : > { %556 = shalt.err (!%p553_p3)
}
 0x1b5   : > { %487 = dma.vmem_to_hbm [thread:$0]  (%p672_p5), %s406_s13, 32, %s408_s14, %s393_s15  }
 0x1b6 PF: > { %p493_p4 = scmp.ge.s32.totalorder %s591_s27, 2  ;;  %s419_s20 = sand.u32 1, %s579_s24  }
 0x1b7   : > { %s420_s23 = scalar_lea.sflag [#allocation3], %s419_s20 }
 0x1b8   : > { %p490_p7 = pnand %p493_p4, %p676_p6 }
 0x1ba   : > { %p491_p8 = pneg %p490_p7 }
 0x1bc   : > { %574 = dma.done.wait (%p491_p8), %s420_s23, 32  }
 0x1bd   : > { %576 = vsyncadd (%p491_p8), %s420_s23, 4294967264  ;;  %p17_p9 = scmp.ge.s32.totalorder %s659_s30, 4   ;;  %s753_s24 = smov %s583_s25 }
 0x1be   : > { %s754_s25 = smov %s587_s26  ;;  %s755_s26 = smov %s670_s10 }
 0x1bf   : > { %s756_s27 = smov %s659_s30  ;;  %19 = sbr.rel (!%p17_p9) target bundleno = 3 (0x3), region = 83 }
 0x1c4   :  { %426 = vsyncpa [#allocation3], 1 }
 0x1c5   :  { %428 = vsyncpa [#allocation3 + $0x1], 1 }

</bundles_post_ra>
